<compile_context>
chip_gen: v7x
topology: tpu7x:2x2x1
jax: 0.10.0
libtpu: 0.0.40
codegen_flags: <defaults>
</compile_context>

<pallas_src>
import jax
import jax.numpy as jnp
from jax import lax
from jax.experimental import pallas as pl
from jax.experimental.pallas import tpu as pltpu


def _cdiv(a, b):
    return -(-a // b)


_LANE_CANDIDATES = (2048, 1024, 512, 256, 128)
_MAX_INT_POW = 16  # largest static integer b handled with VPU multiplies


def _is_v7x():
    try:
        kind = jax.devices()[0].device_kind.lower()
    except Exception:
        return False
    return ("v7" in kind) or ("7x" in kind)


def _choose_layout(total, itemsize, tile_bytes):
    """Pick (lane, rows, tile_rows) for a lane-dense streaming layout."""
    lane = 128
    for cand in _LANE_CANDIDATES:
        if total % cand == 0:
            lane = cand
            break
    rows = _cdiv(total, lane)
    tr = max(8, (tile_bytes // (lane * itemsize)) // 8 * 8)  # multiple of 8
    if rows <= tr:
        tr = rows  # single block == full array (exempt from the (8,128) rule)
    return lane, rows, tr


def _precise_reciprocal(denom):
    # Approx EUP reciprocal + one Newton-Raphson step on the VPU -> ~f32 accurate.
    inv = pl.reciprocal(denom, approx=True)
    return inv * (2.0 - denom * inv)


def _clamp_denom(denom):
    # Avoid inf -> NaN in the Newton step; reference gives d/(1+inf) = 0.
    return jnp.minimum(denom, jnp.float32(3.0e37))


def _pos_int_pow(v, n):
    """v ** n for a static positive integer n, using only VPU multiplies."""
    result = None
    base = v
    while True:
        if n & 1:
            result = base if result is None else result * base
        n >>= 1
        if n == 0:
            break
        base = base * base
    return result


def _make_bell_kernel_static(a, b, c, d):
    """Kernel with a/b/c/d baked in as compile-time constants."""
    inv_a2 = 1.0 / (a * a)
    two_b = 2.0 * b
    is_int_b = (b > 0.0) and float(b).is_integer() and (b <= _MAX_INT_POW)
    is_half_int_b = (
        (not is_int_b)
        and (b > 0.0)
        and float(two_b).is_integer()
        and (two_b <= 2 * _MAX_INT_POW + 1)
    )

    def kernel(x_ref, o_ref):
        x = x_ref[...].astype(jnp.float32)
        t = x - c
        z2 = (t * t) * inv_a2              # ((x-c)/a)^2  (even power -> no abs)
        if b == 1.0:
            denom = 1.0 + z2               # default: two FMAs, no EUP pow
        elif is_int_b:
            denom = 1.0 + _pos_int_pow(z2, int(b))       # VPU repeated squaring
        elif is_half_int_b:
            k = int(b)                                     # b = k + 0.5
            zabs = jnp.sqrt(z2)                            # one EUP op
            p = zabs if k == 0 else _pos_int_pow(z2, k) * zabs
            denom = 1.0 + p
        else:
            # Truly arbitrary b: exp/log pow (assumes b > 0, see header note).
            z2s = jnp.where(z2 > 0.0, z2, 1.0)
            powv = jnp.where(z2 > 0.0, jnp.exp(b * jnp.log(z2s)), 0.0)
            denom = 1.0 + powv
        denom = _clamp_denom(denom)
        o_ref[...] = (d * _precise_reciprocal(denom)).astype(o_ref.dtype)

    return kernel


def _bell_kernel_params(p_ref, x_ref, o_ref):
    """Kernel for traced / learnable parameters (p_ref = [a, b, c, d] in SMEM)."""
    a = p_ref[0]
    b = p_ref[1]
    c = p_ref[2]
    d = p_ref[3]
    x = x_ref[...].astype(jnp.float32)
    inv_a = 1.0 / a                        # scalar reciprocal, once per grid step
    t = (x - c) * inv_a
    z2 = t * t

    def _fast(zz):
        return 1.0 + zz

    def _slow(zz):
        zzs = jnp.where(zz > 0.0, zz, 1.0)
        return 1.0 + jnp.where(zz > 0.0, jnp.exp(b * jnp.log(zzs)), 0.0)

    # Skip the exp/log pow entirely when the runtime value of b is the default.
    denom = lax.cond(b == 1.0, _fast, _slow, z2)
    denom = _clamp_denom(denom)
    o_ref[...] = (d * _precise_reciprocal(denom)).astype(o_ref.dtype)


def bell_mf(x, a=1.0, b=1.0, c=0.0, d=1.0):
    """Elementwise generalized bell MF, Pallas TPU kernel (matches BellMF.forward)."""
    orig_shape = x.shape
    orig_dtype = x.dtype
    out_dtype = orig_dtype if jnp.issubdtype(orig_dtype, jnp.floating) else jnp.float32

    total = 1
    for s in orig_shape:
        total *= int(s)
    if total == 0:
        return jnp.zeros(orig_shape, out_dtype)

    in_itemsize = jnp.dtype(orig_dtype).itemsize
    out_itemsize = jnp.dtype(out_dtype).itemsize
    itemsize = max(in_itemsize, out_itemsize)

    on_v7x = _is_v7x()
    tile_bytes = (4 << 20) if on_v7x else (2 << 20)  # real bytes per buffer
    lane, rows, tr = _choose_layout(total, itemsize, tile_bytes)
    padded_total = rows * lane

    flat = x.reshape(-1)
    if padded_total != total:
        # Only the true ragged case (total % 128 != 0); pad is < 128 elements.
        # TODO(synk): handle the ragged tail in-kernel (SMEM valid-count +
        # masked store) to avoid this full-tensor pad/slice copy entirely.
        flat = jnp.pad(flat, (0, padded_total - total))
    x2 = flat.reshape(rows, lane)

    grid = (pl.cdiv(rows, tr),)            # partial last block is masked by Pallas
    x_spec = pl.BlockSpec((tr, lane), lambda i: (i, 0))
    o_spec = pl.BlockSpec((tr, lane), lambda i: (i, 0))

    if on_v7x:
        dim_sem = (getattr(pltpu, "CORE_PARALLEL", "parallel"),)
    else:
        dim_sem = ("parallel",)
    tile_buf_bytes = tr * lane * itemsize
    vmem_limit = None
    if 4 * tile_buf_bytes > (12 << 20):    # 2 in + 2 out double-buffered
        vmem_limit = int(min(4 * tile_buf_bytes + (16 << 20), 48 << 20))
    cparams = pltpu.CompilerParams(
        dimension_semantics=dim_sem, vmem_limit_bytes=vmem_limit
    )
    out_shape = jax.ShapeDtypeStruct((rows, lane), out_dtype)
    bytes_accessed = padded_total * (in_itemsize + out_itemsize)

    static_params = all(not isinstance(p, jax.Array) for p in (a, b, c, d))
    if static_params:
        af, bf, cf, df = float(a), float(b), float(c), float(d)
        if bf == 1.0 or (bf > 0.0 and float(bf).is_integer() and bf <= _MAX_INT_POW):
            trans_per_elem = 1             # approx reciprocal only
        elif bf > 0.0 and float(2.0 * bf).is_integer():
            trans_per_elem = 2             # + sqrt
        else:
            trans_per_elem = 3             # + log + exp
        cost = pl.CostEstimate(
            flops=8 * padded_total,
            transcendentals=trans_per_elem * padded_total,
            bytes_accessed=bytes_accessed,
        )
        kernel = _make_bell_kernel_static(af, bf, cf, df)
        out2 = pl.pallas_call(
            kernel,
            out_shape=out_shape,
            grid=grid,
            in_specs=[x_spec],
            out_specs=o_spec,
            compiler_params=cparams,
            cost_estimate=cost,
        )(x2)
    else:
        params = jnp.stack(
            [jnp.asarray(p, jnp.float32).reshape(()) for p in (a, b, c, d)]
        )
        cost = pl.CostEstimate(
            flops=8 * padded_total,
            transcendentals=3 * padded_total,
            bytes_accessed=bytes_accessed + 16,
        )
        out2 = pl.pallas_call(
            _bell_kernel_params,
            out_shape=out_shape,
            grid=grid,
            in_specs=[pl.BlockSpec(memory_space=pltpu.SMEM), x_spec],
            out_specs=o_spec,
            compiler_params=cparams,
            cost_estimate=cost,
        )(params, x2)

    out = out2.reshape(padded_total)
    if padded_total != total:
        out = out[:total]
    return out.reshape(orig_shape)


def bell_mf_ref(x, a=1.0, b=1.0, c=0.0, d=1.0):
    """Pure-JAX f32 reference for correctness checking."""
    xf = x.astype(jnp.float32)
    z = jnp.abs((xf - c) / a)
    return d / (1.0 + z ** (2.0 * b))


if __name__ == "__main__":
    key = jax.random.PRNGKey(0)
    k1, k2, k3, k4 = jax.random.split(key, 4)

    # 1) Default parameters (a=1, b=1, c=0, d=1), f32 NCHW input.
    x = jax.random.normal(k1, (2, 4, 16, 16), dtype=jnp.float32)
    y = jax.block_until_ready(bell_mf(x))
    assert y.shape == x.shape and y.dtype == x.dtype
    assert jnp.allclose(y, bell_mf_ref(x), atol=1e-5, rtol=1e-5)

    # 2) bf16 input, static integer b=2 (VPU squaring path), native-dtype I/O.
    xb = jax.random.normal(k2, (2, 8, 16, 16), dtype=jnp.bfloat16)
    yb = jax.block_until_ready(bell_mf(xb, a=1.5, b=2.0, c=0.25, d=0.8))
    assert yb.dtype == jnp.bfloat16 and yb.shape == xb.shape
    assert jnp.allclose(
        yb.astype(jnp.float32), bell_mf_ref(xb, 1.5, 2.0, 0.25, 0.8),
        atol=2e-2, rtol=2e-2,
    )

    # 3) Flat size not a multiple of 128 (ragged pad) + half-integer b (sqrt path).
    xr = jax.random.normal(k3, (2, 3, 7, 5), dtype=jnp.float32)
    yr = jax.block_until_ready(bell_mf(xr, a=0.8, b=1.5, c=-0.3, d=1.2))
    assert yr.shape == xr.shape
    assert jnp.allclose(yr, bell_mf_ref(xr, 0.8, 1.5, -0.3, 1.2), atol=1e-4, rtol=1e-4)

    # 4) Traced (learnable) parameters -> SMEM params + lax.cond path.
    a_t = jnp.array(0.9, jnp.float32)
    b_t = jnp.array(1.0, jnp.float32)
    c_t = jnp.array(0.1, jnp.float32)
    d_t = jnp.array(1.2, jnp.float32)
    yt = jax.block_until_ready(bell_mf(x, a_t, b_t, c_t, d_t))
    assert jnp.allclose(yt, bell_mf_ref(x, 0.9, 1.0, 0.1, 1.2), atol=1e-4, rtol=1e-4)
    b_t2 = jnp.array(1.7, jnp.float32)      # non-default b -> exp/log branch
    yt2 = jax.block_until_ready(bell_mf(x, a_t, b_t2, c_t, d_t))
    assert jnp.allclose(yt2, bell_mf_ref(x, 0.9, 1.7, 0.1, 1.2), atol=1e-4, rtol=5e-4)

    # 5) Multi-block grid with a partial (masked) last block and generic static b.
    xm = jax.random.normal(k4, (600, 2048), dtype=jnp.float32)
    ym = jax.block_until_ready(bell_mf(xm, a=1.0, b=1.3, c=0.2, d=1.0))
    assert ym.shape == xm.shape
    assert jnp.allclose(ym, bell_mf_ref(xm, 1.0, 1.3, 0.2, 1.0), atol=1e-5, rtol=5e-4)

    print("KERNEL_OK")
</pallas_src>

<mosaic_0001>
module attributes {stable_mosaic.version = 11 : i64} {
  func.func @kernel(%arg0: i32, %arg1: memref<1x2048xf32, #tpu.memory_space<vmem>>, %arg2: memref<1x2048xf32, #tpu.memory_space<vmem>>) attributes {dimension_semantics = [#tpu.dimension_semantics<parallel>], iteration_bounds = array<i64: 1>, scalar_prefetch = 0 : i64, scratch_operands = 0 : i64, tpu.core_type = #tpu.core_type<tc>, window_params = [{transform_indices = @transform_0, window_bounds = array<i64: 1, 2048>}, {transform_indices = @transform_1, window_bounds = array<i64: 1, 2048>}]} {
    %c0 = arith.constant 0 : index
    %c0_0 = arith.constant 0 : index
    %0 = vector.load %arg1[%c0, %c0_0] : memref<1x2048xf32, #tpu.memory_space<vmem>>, vector<1x2048xf32>
    %cst = arith.constant 0.000000e+00 : f32
    %1 = vector.broadcast %cst : f32 to vector<1x2048xf32>
    %2 = arith.subf %0, %1 : vector<1x2048xf32>
    %3 = arith.mulf %2, %2 : vector<1x2048xf32>
    %cst_1 = arith.constant 1.000000e+00 : f32
    %4 = vector.broadcast %cst_1 : f32 to vector<1x2048xf32>
    %5 = arith.mulf %3, %4 : vector<1x2048xf32>
    %cst_2 = arith.constant 1.000000e+00 : f32
    %6 = vector.broadcast %cst_2 : f32 to vector<1x2048xf32>
    %7 = arith.addf %6, %5 : vector<1x2048xf32>
    %cst_3 = arith.constant 3.000000e+37 : f32
    %8 = vector.broadcast %cst_3 : f32 to vector<1x2048xf32>
    %9 = arith.minimumf %7, %8 : vector<1x2048xf32>
    %10 = tpu.reciprocal %9 {approx = true} : vector<1x2048xf32> -> vector<1x2048xf32>
    %11 = arith.mulf %9, %10 : vector<1x2048xf32>
    %cst_4 = arith.constant 2.000000e+00 : f32
    %12 = vector.broadcast %cst_4 : f32 to vector<1x2048xf32>
    %13 = arith.subf %12, %11 : vector<1x2048xf32>
    %14 = arith.mulf %10, %13 : vector<1x2048xf32>
    %cst_5 = arith.constant 1.000000e+00 : f32
    %15 = vector.broadcast %cst_5 : f32 to vector<1x2048xf32>
    %16 = arith.mulf %15, %14 : vector<1x2048xf32>
    %c0_6 = arith.constant 0 : index
    %c0_7 = arith.constant 0 : index
    %17 = vector.load %arg2[%c0_6, %c0_7] : memref<1x2048xf32, #tpu.memory_space<vmem>>, vector<1x2048xf32>
    tpu.vector_store %arg2[%c0_6, %c0_7], %16 {strides = array<i32>} : memref<1x2048xf32, #tpu.memory_space<vmem>>, vector<1x2048xf32>,
    return
  }
  func.func @transform_0(%arg0: i32) -> (i32, i32) {
    %c0_i32 = arith.constant 0 : i32
    %c0_i32_0 = arith.constant 0 : i32
    return %arg0, %c0_i32 : i32, i32
  }
  func.func @transform_1(%arg0: i32) -> (i32, i32) {
    %c0_i32 = arith.constant 0 : i32
    %c0_i32_0 = arith.constant 0 : i32
    return %arg0, %c0_i32 : i32, i32
  }
}

</mosaic_0001>

<bundles_post_ra>
// kernel: tpu_custom_call.1
= control target key start
LH: loop header
LB: loop body
LE: loop exit
PB: predicated region body
PF: predicated region fallthrough
CT: control target
= control target key end

     0   :  { %6 = vsyncpa [#allocation3], 0  ;;  %s144_s0 = inlined_call_operand.hbm [shape: f32[1,2048], index: 0, kind: input, shape index: {}]   ;;  %s145_s1 = inlined_call_operand.hbm [shape: f32[1,2048], index: 1, kind: output, shape index: {}]  }
   0x1   :  { %7 = vsyncpa [#allocation4], 0  ;;  %s108_s6 = smov [#allocation2]   ;;  %s60_s10 = scalar_lea.hbm %s144_s0, 256 }
   0x2   :  { %s14_s7 = sshll.u32 %s108_s6, 4  ;;  %p61_p0 = scmp.ne.s32.totalorder %s144_s0, %s60_s10  ;;  %s15_s7 = int_to_ptr.vmem [resolvable:$true] %s14_s7 }
   0x3   :  { %p64_p1 = scmp.lt.u32.totalorder %s60_s10, %s144_s0 }
   0x5   :  { %p66_p2 = pnand %p64_p1, %p61_p0 }
   0x7   :  { %69 = shalt.err (!%p66_p2)
}
   0x8   :  { %s70_s15 = scalar_lea.vmem %s15_s7, 256  ;;  %p75_p4 = scmp.lt.s32.totalorder %s15_s7, %s15_s7 }
   0x9   :  { %p71_p3 = scmp.ne.s32.totalorder %s15_s7, %s70_s15  ;;  %p76_p5 = scmp.lt.s32.totalorder %s70_s15, %s70_s15 }
   0xb   :  { %p77_p6 = por %p76_p5, %p75_p4 }
   0xd   :  { %p78_p7 = pnand %p77_p6, %p71_p3 }
   0xf   :  { %81 = shalt.err (!%p78_p7)
}
  0x10   :  { %17 = dma.hbm_to_vmem [thread:$0]  %s144_s0, 256, %s15_s7, [#allocation3]  }
  0x11   :  { %104 = dma.done.wait [#allocation3], 256  }
  0x12   :  { %105 = vsyncadd [#allocation3], 4294967040  ;;  %v21_v0 = vld [vmem:[#allocation2] sm:$0xff]  ;;  %v22_v1 = vld [vmem:[#allocation2 + $0x8] sm:$0xff]  ;;  %s109_s18 = smov [#allocation5]  }
  0x13   :  { %v23_v2 = vmul.f32 %v21_v0, %v21_v0  ;;  %v24_v3 = vmul.f32 %v22_v1, %v22_v1  ;;  %s45_s19 = sshll.u32 %s109_s18, 4  ;;  %s46_s19 = int_to_ptr.vmem [resolvable:$true] %s45_s19 }
  0x14   :  { %s82_s0 = scalar_lea.vmem %s46_s19, 256  ;;  %p87_p9 = scmp.lt.s32.totalorder %s46_s19, %s46_s19 }
  0x15   :  { %v25_v4 = vadd.f32 1.0, %v23_v2  ;;  %v26_v5 = vadd.f32 1.0, %v24_v3  ;;  %p83_p8 = scmp.ne.s32.totalorder %s46_s19, %s82_s0  ;;  %p88_p10 = scmp.lt.s32.totalorder %s82_s0, %s82_s0 }
  0x17   :  { %v27_v6 = vmin.f32 %v25_v4, 3e+37  ;;  %v28_v7 = vmin.f32 %v26_v5, 3e+37  ;;  %p89_p11 = por %p88_p10, %p87_p9 }
  0x19   :  { %56 = vrcp.f32 %v27_v6  ;;  %p90_p12 = pnand %p89_p11, %p83_p8 }
  0x1a   :  { %58 = vrcp.f32 %v28_v7 }
  0x23   :  { %v57_v8 = vpop.eup %56 }
  0x24   :  { %v59_v9 = vpop.eup %58  ;;  %v31_v10 = vmul.f32 %v57_v8, %v27_v6 }
  0x25   :  { %v32_v11 = vmul.f32 %v59_v9, %v28_v7 }
  0x26   :  { %v33_v12 = vsub.f32 2.0, %v31_v10 }
  0x27   :  { %v34_v13 = vsub.f32 2.0, %v32_v11 }
  0x28   :  { %v35_v14 = vmul.f32 %v57_v8, %v33_v12 }
  0x29   :  { %v36_v15 = vmul.f32 %v59_v9, %v34_v13 }
  0x2a   :  { %37 = vst [vmem:[#allocation5] sm:$0xff] %v35_v14 }
  0x2b   :  { %38 = vst [vmem:[#allocation5 + $0x8] sm:$0xff] %v36_v15 }
  0x2c   :  { %93 = shalt.err (!%p90_p12)
}
  0x2d   :  { %s94_s22 = scalar_lea.hbm %s145_s1, 256 }
  0x2e   :  { %p95_p13 = scmp.ne.s32.totalorder %s145_s1, %s94_s22  ;;  %p98_p0 = scmp.lt.u32.totalorder %s94_s22, %s145_s1 }
  0x30   :  { %p100_p1 = pnand %p98_p0, %p95_p13 }
  0x32   :  { %103 = shalt.err (!%p100_p1)
}
  0x33   :  { %48 = dma.vmem_to_hbm [thread:$0]  %s46_s19, 256, %s145_s1, [#allocation4]  }
  0x34   :  { %106 = dma.done.wait [#allocation4], 256  }
  0x35   :  { %107 = vsyncadd [#allocation4], 4294967040 }
  0x36   :  { %52 = vsyncpa [#allocation3], 1 }
  0x37   :  { %53 = vsyncpa [#allocation4], 1 }

</bundles_post_ra>
